<compile_context>
chip_gen: v6e
topology: v6e:2x2x1
jax: 0.10.0
libtpu: 0.0.40
codegen_flags: <defaults>
</compile_context>

<pallas_src>
import functools

import jax
import jax.numpy as jnp
from jax.experimental import pallas as pl
from jax.experimental.pallas import tpu as pltpu


def _round_up(a: int, m: int) -> int:
    return (a + m - 1) // m * m


def _vmem_bytes(tb: int, d_in: int, h: int, in_itemsize: int) -> int:
    x_buf = 2 * tb * d_in * in_itemsize          # double-buffered x tiles
    o_buf = 2 * tb * 4                           # double-buffered (1, TB) f32 output tiles
    w_buf = 2 * (d_in * h * in_itemsize + 2 * h * 4)  # resident w1/b1/w2 (conservative x2)
    return x_buf + o_buf + w_buf


def _feedforward_kernel(x_ref, w1_ref, b1_ref, w2_ref, o_ref, *, approx_recip):
    # x: (TB, D_in) f32/bf16, w1: (D_in, H) f32/bf16, b1: (1, H) f32,
    # w2: (1, H) f32 (b2 already folded in), o: (1, TB) f32 (batch on lanes).
    x = x_ref[...]
    w1 = w1_ref[...]

    # Linear 1 on the MXU, f32 accumulation.
    h = jnp.dot(x, w1, preferred_element_type=jnp.float32)
    h = h + b1_ref[...].astype(jnp.float32)                       # (TB, H)

    # Numerically-stable exponentials for the softmax.
    m = jnp.max(h, axis=-1, keepdims=True)                        # (TB, 1)
    e = jnp.exp(h - m)                                            # (TB, H)

    # Fused softmax + second Linear (+ bias folded into w2):
    #   softmax(h) @ w2 + b2 == sum(e * (w2 + b2), -1) / sum(e, -1)
    w2 = w2_ref[...].astype(jnp.float32)                          # (1, H)
    num = jnp.sum(e * w2, axis=-1, keepdims=True)                 # (TB, 1)
    den = jnp.sum(e, axis=-1, keepdims=True)                      # (TB, 1)
    o = num * pl.reciprocal(den, approx=approx_recip)             # (TB, 1)

    # Sigmoid in f32 (reciprocal can go to the otherwise-idle EUP slot).
    y = pl.reciprocal(1.0 + jnp.exp(-o), approx=approx_recip)     # (TB, 1)

    # Lane-dense store: per-row scalars relaid out onto lanes.
    o_ref[...] = y.reshape((1, y.shape[0]))                       # (1, TB)


def feedforward(x, w1, b1, w2, b2, *, block_b=512, use_bf16=False, approx_reciprocal=None):
    """x: (B, D_in); w1: (D_in, H); b1: (H,); w2: (H, 1); b2: (1,).

    Returns (B, 1) f32, matching torch.nn.Sequential(Linear, Softmax(-1), Linear, Sigmoid)
    with weights stored pre-transposed as (in_features, out_features).
    """
    if approx_reciprocal is None:
        approx_reciprocal = use_bf16  # only trade exactness when bf16 already did

    B, D_in = x.shape
    H = w1.shape[1]

    in_dtype = jnp.bfloat16 if use_bf16 else jnp.float32
    in_itemsize = jnp.dtype(in_dtype).itemsize

    # --- batch tile: multiple of 128 (lane-dense output), shrunk to a VMEM budget ---
    tb = min(int(block_b), _round_up(B, 128))
    tb = _round_up(tb, 128)
    budget = 20 * 1024 * 1024  # conservative: leaves headroom even on v7x (64 MiB VMEM)
    while tb > 128 and _vmem_bytes(tb, D_in, H, in_itemsize) > budget:
        tb = max(128, (tb // 2) // 128 * 128)
    b_pad = _round_up(B, tb)
    grid = (b_pad // tb,)

    # --- prepare operands ---
    x_p = x.astype(in_dtype)
    if b_pad != B:
        x_p = jnp.pad(x_p, ((0, b_pad - B), (0, 0)))
    w1_c = w1.astype(in_dtype)
    b1_row = b1.reshape(1, H).astype(jnp.float32)
    # Fold b2 into w2: softmax rows sum to 1, so s @ w2 + b2 == s @ (w2 + b2).
    w2_row = (w2.reshape(1, H) + b2.reshape(1, 1)).astype(jnp.float32)

    kernel = functools.partial(_feedforward_kernel, approx_recip=approx_reciprocal)

    flops = 2 * b_pad * D_in * H + 6 * b_pad * H
    transcendentals = b_pad * H + 2 * b_pad
    bytes_accessed = (b_pad * D_in * in_itemsize + D_in * H * in_itemsize
                      + 2 * H * 4 + b_pad * 4)

    out = pl.pallas_call(
        kernel,
        out_shape=jax.ShapeDtypeStruct((1, b_pad), jnp.float32),
        grid_spec=pltpu.PrefetchScalarGridSpec(
            num_scalar_prefetch=0,
            grid=grid,
            in_specs=[
                pl.BlockSpec((tb, D_in), lambda i: (i, 0)),   # x tile, streamed
                pl.BlockSpec((D_in, H), lambda i: (0, 0)),    # w1, VMEM-resident
                pl.BlockSpec((1, H), lambda i: (0, 0)),       # b1
                pl.BlockSpec((1, H), lambda i: (0, 0)),       # w2 (+ folded b2)
            ],
            out_specs=pl.BlockSpec((1, tb), lambda i: (0, i)),  # lane-dense output slab
        ),
        compiler_params=pltpu.CompilerParams(
            dimension_semantics=("parallel",),
            vmem_limit_bytes=int(min(max(2 * _vmem_bytes(tb, D_in, H, in_itemsize),
                                         32 * 1024 * 1024),
                                     56 * 1024 * 1024)),
        ),
        cost_estimate=pl.CostEstimate(
            flops=flops,
            transcendentals=transcendentals,
            bytes_accessed=bytes_accessed,
        ),
    )(x_p, w1_c, b1_row, w2_row)

    return out[0, :B].reshape(B, 1)


def feedforward_ref(x, w1, b1, w2, b2):
    h = x @ w1 + b1
    s = jax.nn.softmax(h, axis=-1)
    o = s @ w2 + b2
    return jax.nn.sigmoid(o)


if __name__ == "__main__":
    # Small shapes consistent with the module: batch=8, input_size=32, hidden=32.
    batch, input_size, hidden_size = 8, 32, 32

    key = jax.random.PRNGKey(0)
    kx, kw1, kb1, kw2, kb2 = jax.random.split(key, 5)

    x = jax.random.normal(kx, (batch, input_size), dtype=jnp.float32)

    # PyTorch Linear stores (out, in); we keep the transposed (in, out) layout.
    bound1 = 1.0 / (input_size ** 0.5)
    w1 = jax.random.uniform(kw1, (input_size, hidden_size), jnp.float32, -bound1, bound1)
    b1 = jax.random.uniform(kb1, (hidden_size,), jnp.float32, -bound1, bound1)
    bound2 = 1.0 / (hidden_size ** 0.5)
    w2 = jax.random.uniform(kw2, (hidden_size, 1), jnp.float32, -bound2, bound2)
    b2 = jax.random.uniform(kb2, (1,), jnp.float32, -bound2, bound2)

    ref = feedforward_ref(x, w1, b1, w2, b2)

    # Exact f32 path.
    out = feedforward(x, w1, b1, w2, b2)
    out = jax.block_until_ready(out)
    assert out.shape == (batch, 1), out.shape
    assert jnp.allclose(out, ref, atol=1e-5, rtol=1e-5), (out, ref)

    # Fast path: bf16 matmul operands (f32 accumulate) + approx reciprocals.
    out_fast = feedforward(x, w1, b1, w2, b2, use_bf16=True)
    out_fast = jax.block_until_ready(out_fast)
    assert out_fast.shape == (batch, 1), out_fast.shape
    assert jnp.allclose(out_fast, ref, atol=2e-2, rtol=2e-2), (out_fast, ref)

    print("KERNEL_OK")
</pallas_src>

<mosaic_0001>
module attributes {stable_mosaic.version = 11 : i64} {
  func.func @_feedforward_kernel(%arg0: i32, %arg1: memref<128x32xf32, #tpu.memory_space<vmem>>, %arg2: memref<32x32xf32, #tpu.memory_space<vmem>>, %arg3: memref<1x32xf32, #tpu.memory_space<vmem>>, %arg4: memref<1x32xf32, #tpu.memory_space<vmem>>, %arg5: memref<1x128xf32, #tpu.memory_space<vmem>>) attributes {dimension_semantics = [#tpu.dimension_semantics<parallel>], iteration_bounds = array<i64: 1>, scalar_prefetch = 0 : i64, scratch_operands = 0 : i64, tpu.core_type = #tpu.core_type<tc>, window_params = [{transform_indices = @transform_0, window_bounds = array<i64: 128, 32>}, {pipeline_mode = #tpu.pipeline_mode<synchronous>, transform_indices = @transform_1, window_bounds = array<i64: 32, 32>}, {pipeline_mode = #tpu.pipeline_mode<synchronous>, transform_indices = @transform_2, window_bounds = array<i64: 1, 32>}, {pipeline_mode = #tpu.pipeline_mode<synchronous>, transform_indices = @transform_3, window_bounds = array<i64: 1, 32>}, {transform_indices = @transform_4, window_bounds = array<i64: 1, 128>}]} {
    %c0 = arith.constant 0 : index
    %c0_0 = arith.constant 0 : index
    %0 = vector.load %arg1[%c0, %c0_0] : memref<128x32xf32, #tpu.memory_space<vmem>>, vector<128x32xf32>
    %c0_1 = arith.constant 0 : index
    %c0_2 = arith.constant 0 : index
    %1 = vector.load %arg2[%c0_1, %c0_2] : memref<32x32xf32, #tpu.memory_space<vmem>>, vector<32x32xf32>
    %cst = arith.constant dense<0.000000e+00> : vector<128x32xf32>
    %2 = tpu.matmul %0, %1, %cst {dimension_numbers = #tpu.dot_dimension_numbers<[1], [0], [0], [1], [0, 0, 1, 1], [], []>} : vector<128x32xf32>, vector<32x32xf32>, vector<128x32xf32> -> vector<128x32xf32>
    %c0_3 = arith.constant 0 : index
    %c0_4 = arith.constant 0 : index
    %3 = vector.load %arg3[%c0_3, %c0_4] : memref<1x32xf32, #tpu.memory_space<vmem>>, vector<1x32xf32>
    %4 = vector.broadcast %3 : vector<1x32xf32> to vector<128x32xf32>
    %5 = arith.addf %2, %4 : vector<128x32xf32>
    %cst_5 = arith.constant dense<0xFF800000> : vector<128xf32>
    %6 = vector.multi_reduction <maximumf>, %5, %cst_5 [1] : vector<128x32xf32> to vector<128xf32>
    %7 = vector.shape_cast %6 : vector<128xf32> to vector<128x1xf32>
    %8 = vector.broadcast %7 : vector<128x1xf32> to vector<128x32xf32>
    %9 = arith.subf %5, %8 : vector<128x32xf32>
    %10 = math.exp %9 : vector<128x32xf32>
    %c0_6 = arith.constant 0 : index
    %c0_7 = arith.constant 0 : index
    %11 = vector.load %arg4[%c0_6, %c0_7] : memref<1x32xf32, #tpu.memory_space<vmem>>, vector<1x32xf32>
    %12 = vector.broadcast %11 : vector<1x32xf32> to vector<128x32xf32>
    %13 = arith.mulf %10, %12 : vector<128x32xf32>
    %cst_8 = arith.constant dense<0.000000e+00> : vector<128xf32>
    %14 = vector.multi_reduction <add>, %13, %cst_8 [1] : vector<128x32xf32> to vector<128xf32>
    %15 = vector.shape_cast %14 : vector<128xf32> to vector<128x1xf32>
    %cst_9 = arith.constant dense<0.000000e+00> : vector<128xf32>
    %16 = vector.multi_reduction <add>, %10, %cst_9 [1] : vector<128x32xf32> to vector<128xf32>
    %17 = vector.shape_cast %16 : vector<128xf32> to vector<128x1xf32>
    %18 = tpu.reciprocal %17 : vector<128x1xf32> -> vector<128x1xf32>
    %19 = arith.mulf %15, %18 : vector<128x1xf32>
    %cst_10 = arith.constant 0.000000e+00 : f32
    %20 = vector.broadcast %cst_10 : f32 to vector<128x1xf32>
    %21 = arith.subf %20, %19 : vector<128x1xf32>
    %22 = math.exp %21 : vector<128x1xf32>
    %cst_11 = arith.constant 1.000000e+00 : f32
    %23 = vector.broadcast %cst_11 : f32 to vector<128x1xf32>
    %24 = arith.addf %23, %22 : vector<128x1xf32>
    %25 = tpu.reciprocal %24 : vector<128x1xf32> -> vector<128x1xf32>
    %26 = vector.shape_cast %25 : vector<128x1xf32> to vector<1x128xf32>
    %c0_12 = arith.constant 0 : index
    %c0_13 = arith.constant 0 : index
    %27 = vector.load %arg5[%c0_12, %c0_13] : memref<1x128xf32, #tpu.memory_space<vmem>>, vector<1x128xf32>
    tpu.vector_store %arg5[%c0_12, %c0_13], %26 {strides = array<i32>} : memref<1x128xf32, #tpu.memory_space<vmem>>, vector<1x128xf32>,
    return
  }
  func.func @transform_0(%arg0: i32) -> (i32, i32) {
    %c0_i32 = arith.constant 0 : i32
    %c0_i32_0 = arith.constant 0 : i32
    return %arg0, %c0_i32 : i32, i32
  }
  func.func @transform_1(%arg0: i32) -> (i32, i32) {
    %c0_i32 = arith.constant 0 : i32
    %c0_i32_0 = arith.constant 0 : i32
    %c0_i32_1 = arith.constant 0 : i32
    return %c0_i32, %c0_i32_0 : i32, i32
  }
  func.func @transform_2(%arg0: i32) -> (i32, i32) {
    %c0_i32 = arith.constant 0 : i32
    %c0_i32_0 = arith.constant 0 : i32
    %c0_i32_1 = arith.constant 0 : i32
    return %c0_i32, %c0_i32_0 : i32, i32
  }
  func.func @transform_3(%arg0: i32) -> (i32, i32) {
    %c0_i32 = arith.constant 0 : i32
    %c0_i32_0 = arith.constant 0 : i32
    %c0_i32_1 = arith.constant 0 : i32
    return %c0_i32, %c0_i32_0 : i32, i32
  }
  func.func @transform_4(%arg0: i32) -> (i32, i32) {
    %c0_i32 = arith.constant 0 : i32
    %c0_i32_0 = arith.constant 0 : i32
    return %c0_i32, %arg0 : i32, i32
  }
}

</mosaic_0001>

<bundles_post_ra>
// kernel: tpu_custom_call.1
= control target key start
LH: loop header
LB: loop body
LE: loop exit
PB: predicated region body
PF: predicated region fallthrough
CT: control target
= control target key end

     0   :  { %vm45_vm0 = vcmask 261120   ;;  %s1231_s0 = inlined_call_operand.vmem [shape: f32[128,32], index: 0, kind: input, shape index: {}]   ;;  %s1232_s1 = inlined_call_operand.vmem [shape: f32[32,32], index: 1, kind: input, shape index: {}]   ;;  %s1233_s2 = inlined_call_operand.vmem [shape: f32[1,32], index: 2, kind: input, shape index: {}]   ;;  %s1234_s3 = inlined_call_operand.vmem [shape: f32[1,32], index: 3, kind: input, shape index: {}]   ;;  %s1235_s4 = inlined_call_operand.hbm [shape: f32[1,128], index: 4, kind: output, shape index: {}]  }
   0x1   :  { %v37_v0 = vld [vmem:[%s1232_s1 + $0x18] sm:$0xff]  ;;  %v36_v1 = vld [vmem:[%s1232_s1 + $0x10] sm:$0xff]  ;;  %v35_v2 = vld [vmem:[%s1232_s1 + $0x8] sm:$0xff] }
   0x2   :  { %747 = vmatprep.subr.mxu0 %v37_v0  ;;  %779 = vmatprep.subr.mxu1 %v37_v0  ;;  %v34_v3 = vld [vmem:[%s1232_s1] sm:$0xff] }
   0x3   :  { %748 = vmatpush3.msra.mxu0 %v37_v0  ;;  %783 = vmatpush3.msra.mxu1 %v37_v0  ;;  %v18_v4 = vld [vmem:[%s1231_s0] sm:$0xff] }
   0x4   :  { %749 = vmatprep.subr.mxu0 %v36_v1  ;;  %780 = vmatprep.subr.mxu1 %v36_v1  ;;  %v26_v5 = vld [vmem:[%s1231_s0 + $0x40] sm:$0xff] }
   0x5   :  { %750 = vmatpush3.msra.mxu0 %v36_v1  ;;  %784 = vmatpush3.msra.mxu1 %v36_v1 }
   0x6   :  { %751 = vmatprep.subr.mxu0 %v35_v2  ;;  %781 = vmatprep.subr.mxu1 %v35_v2 }
   0x7   :  { %752 = vmatpush3.msra.mxu0 %v35_v2  ;;  %785 = vmatpush3.msra.mxu1 %v35_v2 }
   0x8   :  { %9 = vsyncpa [#allocation3], 0  ;;  %753 = vmatprep.subr.mxu0 %v34_v3  ;;  %782 = vmatprep.subr.mxu1 %v34_v3  ;;  %v19_v6 = vld [vmem:[%s1231_s0 + $0x8] sm:$0xff]  ;;  %v20_v8 = vld [vmem:[%s1231_s0 + $0x10] sm:$0xff]  ;;  %vm593_vm1 = vcmask 130112   ;;  %vm600_vm2 = vcmask 195712  }
   0x9   :  { %v27_v7 = vld [vmem:[%s1231_s0 + $0x48] sm:$0xff]  ;;  %754 = vmatpush3.msra.mxu0 %v34_v3  ;;  %786 = vmatpush3.msra.mxu1 %v34_v3  ;;  %v28_v9 = vld [vmem:[%s1231_s0 + $0x50] sm:$0xff]  ;;  %v21_v10 = vld [vmem:[%s1231_s0 + $0x18] sm:$0xff]  ;;  %vm607_vm3 = vcmask 261312   ;;  %vm614_vm4 = vcmask 326912   ;;  %vm621_vm5 = vcmask 392512  }
   0xa   :  { %755 = vmatprep.mubr.msk.f32.mxu0 %vm45_vm0, %v18_v4  ;;  %767 = vmatprep.mubr.msk.f32.mxu1 %vm45_vm0, %v26_v5  ;;  %v29_v11 = vld [vmem:[%s1231_s0 + $0x58] sm:$0xff]  ;;  %v22_v12 = vld [vmem:[%s1231_s0 + $0x20] sm:$0xff]  ;;  %v23_v14 = vld [vmem:[%s1231_s0 + $0x28] sm:$0xff]  ;;  %vm628_vm6 = vcmask 458112   ;;  %vm635_vm7 = vcmask 523712   ;;  %vm642_vm8 = vcmask 589312  }
   0xb   :  { %756 = vmatmul.mubr.msk.f32.vlgmr.msra.gmra.mxu0 %vm45_vm0, %v19_v6  ;;  %768 = vmatmul.mubr.msk.f32.vlgmr.msra.gmra.mxu1 %vm45_vm0, %v27_v7  ;;  %v30_v13 = vld [vmem:[%s1231_s0 + $0x60] sm:$0xff]  ;;  %v31_v15 = vld [vmem:[%s1231_s0 + $0x68] sm:$0xff]  ;;  %v24_v16 = vld [vmem:[%s1231_s0 + $0x30] sm:$0xff]  ;;  %vm649_vm9 = vcmask 654912   ;;  %vm656_vm10 = vcmask 720512   ;;  %vm663_vm11 = vcmask 786112  }
   0xc   :  { %758 = vmatprep.mubr.msk.f32.mxu0 %vm45_vm0, %v20_v8  ;;  %770 = vmatprep.mubr.msk.f32.mxu1 %vm45_vm0, %v28_v9  ;;  %v32_v17 = vld [vmem:[%s1231_s0 + $0x70] sm:$0xff]  ;;  %v25_v18 = vld [vmem:[%s1231_s0 + $0x38] sm:$0xff]  ;;  %v709_v20 = vld [vmem:[%s1233_s2] ss:$0 sm:$0xff]  ;;  %vm670_vm12 = vcmask 851712   ;;  %vm677_vm13 = vcmask 917312  }
   0xd   :  { %v33_v19 = vld [vmem:[%s1231_s0 + $0x78] sm:$0xff]  ;;  %vm684_vm14 = vcmask 982912   ;;  %vm691_vm15 = vcmask 1048512  }
   0xf   :  { %759 = vmatmul.mubr.msk.f32.gmra.mxu0 %vm45_vm0, %v21_v10  ;;  %771 = vmatmul.mubr.msk.f32.gmra.mxu1 %vm45_vm0, %v29_v11 }
  0x10   :  { %761 = vmatprep.mubr.msk.f32.mxu0 %vm45_vm0, %v22_v12  ;;  %773 = vmatprep.mubr.msk.f32.mxu1 %vm45_vm0, %v30_v13 }
  0x13   :  { %762 = vmatmul.mubr.msk.f32.gmra.mxu0 %vm45_vm0, %v23_v14  ;;  %774 = vmatmul.mubr.msk.f32.gmra.mxu1 %vm45_vm0, %v31_v15 }
  0x14   :  { %764 = vmatprep.mubr.msk.f32.mxu0 %vm45_vm0, %v24_v16  ;;  %776 = vmatprep.mubr.msk.f32.mxu1 %vm45_vm0, %v32_v17 }
  0x17   :  { %765 = vmatmul.mubr.msk.f32.gmra.mxu0 %vm45_vm0, %v25_v18  ;;  %777 = vmatmul.mubr.msk.f32.gmra.mxu1 %vm45_vm0, %v33_v19 }
  0xcb   :  { %v757_v21 = vpop.f32.mrf.mxu0  ;;  %v769_v22 = vpop.f32.mrf.mxu1 }
  0xcc   :  { %v1043_v23 = vadd.f32 %v757_v21, %v709_v20  ;;  %v1045_v24 = vadd.f32 %v769_v22, %v709_v20 }
  0xcd   :  { %v160_v25 = vpop.f32.mrf.mxu0  ;;  %v200_v26 = vpop.f32.mrf.mxu1 }
  0xce   :  { %v1047_v27 = vadd.f32 %v709_v20, %v160_v25  ;;  %v266_v28 = vsel %vm45_vm0, %v1045_v24, -inf  ;;  %v242_v29 = vsel %vm45_vm0, %v1043_v23, -inf  ;;  %v1057_v36 = vadd.f32 %v709_v20, %v200_v26 }
  0xcf   :  { %267 = vmax.xlane.f32.xlu1 %v266_v28  ;;  %243 = vmax.xlane.f32.xlu0 %v242_v29  ;;  %v760_v30 = vpop.f32.mrf.mxu0  ;;  %v772_v31 = vpop.f32.mrf.mxu1 }
  0xd0   :  { %v1053_v32 = vadd.f32 %v760_v30, %v709_v20  ;;  %v1055_v33 = vadd.f32 %v772_v31, %v709_v20  ;;  %v239_v38 = vsel %vm45_vm0, %v1047_v27, -inf  ;;  %v263_v45 = vsel %vm45_vm0, %v1057_v36, -inf }
  0xd1   :  { %v170_v34 = vpop.f32.mrf.mxu0  ;;  %v210_v35 = vpop.f32.mrf.mxu1 }
  0xd2   :  { %v248_v37 = vsel %vm45_vm0, %v1053_v32, -inf  ;;  %v1063_v40 = vadd.f32 %v709_v20, %v210_v35  ;;  %v272_v41 = vsel %vm45_vm0, %v1055_v33, -inf  ;;  %v1067_v44 = vadd.f32 %v709_v20, %v170_v34 }
  0xd3   :  { %249 = vmax.xlane.f32.xlu1 %v248_v37  ;;  %240 = vmax.xlane.f32.xlu0 %v239_v38  ;;  %v763_v39 = vpop.f32.mrf.mxu0  ;;  %v775_v43 = vpop.f32.mrf.mxu1 }
  0xd4   :  { %v1071_v47 = vadd.f32 %v763_v39, %v709_v20  ;;  %v269_v49 = vsel %vm45_vm0, %v1063_v40, -inf  ;;  %v245_v52 = vsel %vm45_vm0, %v1067_v44, -inf  ;;  %v1087_v58 = vadd.f32 %v775_v43, %v709_v20  ;;  %v1126_v43 = vld [vmem:[%s1234_s3] ss:$0 sm:$0xff]  ;;  %s938_s3 = smov [#allocation2]  }
  0xd5   :  { %v180_v42 = vpop.f32.mrf.mxu0  ;;  %v220_v51 = vpop.f32.mrf.mxu1  ;;  %s701_s29 = sshll.u32 %s938_s3, 4  ;;  %s702_s29 = int_to_ptr.vmem [resolvable:$true] %s701_s29 }
  0xd6   :  { %v1073_v48 = vadd.f32 %v709_v20, %v180_v42  ;;  %v254_v55 = vsel %vm45_vm0, %v1071_v47, -inf  ;;  %v1089_v59 = vadd.f32 %v709_v20, %v220_v51  ;;  %v278_v1 = vsel %vm45_vm0, %v1087_v58, -inf  ;;  %s916_s30 = scalar_lea.vmem %s702_s29, 16  ;;  %s920_s5 = scalar_lea.vmem %s702_s29, 32 }
  0xd7   :  { %273 = vmax.xlane.f32.xlu1 %v272_v41  ;;  %264 = vmax.xlane.f32.xlu0 %v263_v45  ;;  %v766_v46 = vpop.f32.mrf.mxu0  ;;  %v778_v57 = vpop.f32.mrf.mxu1  ;;  %p917_p0 = scmp.ne.s32.totalorder %s702_s29, %s916_s30  ;;  %p921_p1 = scmp.lt.s32.totalorder %s702_s29, %s702_s29 }
  0xd8   :  { %v1079_v53 = vadd.f32 %v766_v46, %v709_v20  ;;  %v251_v56 = vsel %vm45_vm0, %v1073_v48, -inf  ;;  %v1095_v63 = vadd.f32 %v778_v57, %v709_v20  ;;  %v275_v2 = vsel %vm45_vm0, %v1089_v59, -inf  ;;  %p922_p2 = scmp.lt.s32.totalorder %s920_s5, %s916_s30 }
  0xd9   :  { %v190_v50 = vpop.f32.mrf.mxu0  ;;  %v230_v62 = vpop.f32.mrf.mxu1 }
  0xda   :  { %v1081_v54 = vadd.f32 %v709_v20, %v190_v50  ;;  %v260_v60 = vsel %vm45_vm0, %v1079_v53, -inf  ;;  %v1097_v0 = vadd.f32 %v709_v20, %v230_v62  ;;  %v284_v3 = vsel %vm45_vm0, %v1095_v63, -inf  ;;  %p923_p3 = por %p922_p2, %p921_p1 }
  0xdb   :  { %246 = vmax.xlane.f32.xlu1 %v245_v52  ;;  %270 = vmax.xlane.f32.xlu0 %v269_v49 }
  0xdc   :  { %v257_v61 = vsel %vm45_vm0, %v1081_v54, -inf  ;;  %v281_v4 = vsel %vm45_vm0, %v1097_v0, -inf  ;;  %p924_p4 = pnand %p923_p3, %p917_p0 }
  0xdf   :  { %255 = vmax.xlane.f32.xlu1 %v254_v55  ;;  %252 = vmax.xlane.f32.xlu0 %v251_v56 }
  0xe3   :  { %261 = vmax.xlane.f32.xlu1 %v260_v60  ;;  %258 = vmax.xlane.f32.xlu0 %v257_v61 }
  0xe7   :  { %279 = vmax.xlane.f32.xlu1 %v278_v1  ;;  %276 = vmax.xlane.f32.xlu0 %v275_v2 }
  0xeb   :  { %285 = vmax.xlane.f32.xlu1 %v284_v3  ;;  %282 = vmax.xlane.f32.xlu0 %v281_v4 }
 0x158   :  { %v268_v5 = vpop.xlane.xlu1 %267  ;;  %v244_v6 = vpop.xlane.xlu0 %243 }
 0x159   :  { %v296_v7 = vsub.f32 %v1045_v24, %v268_v5  ;;  %v288_v8 = vsub.f32 %v1043_v23, %v244_v6 }
 0x15b   :  { %v305_v9 = vmul.f32 1.442695, %v288_v8  ;;  %v321_v10 = vmul.f32 1.442695, %v296_v7 }
 0x15c   :  { %v250_v11 = vpop.xlane.xlu1 %249  ;;  %v241_v12 = vpop.xlane.xlu0 %240 }
 0x15d   :  { %v290_v13 = vsub.f32 %v1053_v32, %v250_v11  ;;  %v287_v14 = vsub.f32 %v1047_v27, %v241_v12  ;;  %788 = vpow2.f32 %v305_v9 }
 0x15e   :  { %790 = vpow2.f32 %v321_v10 }
 0x15f   :  { %v303_v15 = vmul.f32 1.442695, %v287_v14  ;;  %v309_v16 = vmul.f32 1.442695, %v290_v13 }
 0x160   :  { %v274_v17 = vpop.xlane.xlu1 %273  ;;  %v265_v18 = vpop.xlane.xlu0 %264 }
 0x161   :  { %v298_v19 = vsub.f32 %v1055_v33, %v274_v17  ;;  %v295_v20 = vsub.f32 %v1057_v36, %v265_v18  ;;  %792 = vpow2.f32 %v303_v15 }
 0x162   :  { %794 = vpow2.f32 %v309_v16 }
 0x163   :  { %v319_v21 = vmul.f32 1.442695, %v295_v20  ;;  %v325_v22 = vmul.f32 1.442695, %v298_v19 }
 0x164   :  { %v247_v23 = vpop.xlane.xlu1 %246  ;;  %v271_v24 = vpop.xlane.xlu0 %270 }
 0x165   :  { %v289_v25 = vsub.f32 %v1067_v44, %v247_v23  ;;  %796 = vpow2.f32 %v319_v21  ;;  %v297_v27 = vsub.f32 %v1063_v40, %v271_v24 }
 0x166   :  { %798 = vpow2.f32 %v325_v22 }
 0x167   :  { %v307_v26 = vmul.f32 1.442695, %v289_v25  ;;  %v323_v32 = vmul.f32 1.442695, %v297_v27 }
 0x168   :  { %v256_v28 = vpop.xlane.xlu1 %255  ;;  %v253_v29 = vpop.xlane.xlu0 %252 }
 0x169   :  { %v292_v31 = vsub.f32 %v1071_v47, %v256_v28  ;;  %800 = vpow2.f32 %v307_v26  ;;  %v291_v39 = vsub.f32 %v1073_v48, %v253_v29 }
 0x16a   :  { %v789_v30 = vpop.eup %788  ;;  %802 = vpow2.f32 %v323_v32 }
 0x16b   :  { %v409_v33 = vsel %vm45_vm0, %v789_v30, 0.0  ;;  %v1117_v36 = vpop.eup %790  ;;  %v313_v38 = vmul.f32 1.442695, %v292_v31  ;;  %v311_v48 = vmul.f32 1.442695, %v291_v39  ;;  %v343_v49 = vmul.f32 %v789_v30, %v1126_v43 }
 0x16c   :  { %v262_v34 = vpop.xlane.xlu1 %261  ;;  %v259_v35 = vpop.xlane.xlu0 %258  ;;  %410 = vadd.xlane.f32.xlu1 %v409_v33  ;;  %v433_v40 = vsel %vm45_vm0, %v1117_v36, 0.0  ;;  %v351_v32 = vmul.f32 %v1117_v36, %v1126_v43 }
 0x16d   :  { %804 = vpow2.f32 %v313_v38  ;;  %v294_v57 = vsub.f32 %v1079_v53, %v262_v34  ;;  %v293_v3 = vsub.f32 %v1081_v54, %v259_v35 }
 0x16e   :  { %v793_v37 = vpop.eup %792  ;;  %806 = vpow2.f32 %v311_v48  ;;  %v385_v34 = vsel %vm45_vm0, %v351_v32, 0.0 }
 0x16f   :  { %v406_v42 = vsel %vm45_vm0, %v793_v37, 0.0  ;;  %v795_v44 = vpop.eup %794  ;;  %v317_v2 = vmul.f32 1.442695, %v294_v57  ;;  %v315_v8 = vmul.f32 1.442695, %v293_v3 }
 0x170   :  { %v280_v41 = vpop.xlane.xlu1 %279  ;;  %434 = vadd.xlane.f32.xlu1 %v433_v40  ;;  %407 = vadd.xlane.f32.xlu0 %v406_v42  ;;  %v277_v46 = vpop.xlane.xlu0 %276  ;;  %v415_v52 = vsel %vm45_vm0, %v795_v44, 0.0  ;;  %v345_v4 = vmul.f32 %v795_v44, %v1126_v43 }
 0x171   :  { %v300_v45 = vsub.f32 %v1087_v58, %v280_v41  ;;  %v299_v51 = vsub.f32 %v1089_v59, %v277_v46  ;;  %v361_v58 = vsel %vm45_vm0, %v343_v49, 0.0  ;;  %v342_v59 = vmul.f32 %v793_v37, %v1126_v43 }
 0x172   :  { %v1129_v47 = vpop.eup %796  ;;  %v367_v11 = vsel %vm45_vm0, %v345_v4, 0.0 }
 0x173   :  { %v329_v50 = vmul.f32 1.442695, %v300_v45  ;;  %v430_v55 = vsel %vm45_vm0, %v1129_v47, 0.0  ;;  %v1136_v56 = vpop.eup %798  ;;  %v327_v60 = vmul.f32 1.442695, %v299_v51  ;;  %v358_v5 = vsel %vm45_vm0, %v342_v59, 0.0 }
 0x174   :  { %416 = vadd.xlane.f32.xlu1 %v415_v52  ;;  %431 = vadd.xlane.f32.xlu0 %v430_v55  ;;  %v439_v61 = vsel %vm45_vm0, %v1136_v56, 0.0  ;;  %v286_v1 = vpop.xlane.xlu1 %285  ;;  %v283_v13 = vpop.xlane.xlu0 %282  ;;  %v350_v33 = vmul.f32 %v1129_v47, %v1126_v43  ;;  %v353_v37 = vmul.f32 %v1136_v56, %v1126_v43 }
 0x175   :  { %808 = vpow2.f32 %v329_v50  ;;  %v302_v53 = vsub.f32 %v1095_v63, %v286_v1  ;;  %v301_v14 = vsub.f32 %v1097_v0, %v283_v13 }
 0x176   :  { %v801_v62 = vpop.eup %800  ;;  %810 = vpow2.f32 %v327_v60  ;;  %v382_v35 = vsel %vm45_vm0, %v350_v33, 0.0  ;;  %v391_v39 = vsel %vm45_vm0, %v353_v37, 0.0 }
 0x177   :  { %v412_v6 = vsel %vm45_vm0, %v801_v62, 0.0  ;;  %v803_v7 = vpop.eup %802  ;;  %812 = vpow2.f32 %v317_v2  ;;  %v333_v10 = vmul.f32 1.442695, %v302_v53  ;;  %v344_v12 = vmul.f32 %v801_v62, %v1126_v43 }
 0x178   :  { %440 = vadd.xlane.f32.xlu1 %v439_v61  ;;  %362 = vadd.xlane.f32.xlu0 %v361_v58  ;;  %v436_v54 = vsel %vm45_vm0, %v803_v7, 0.0  ;;  %814 = vpow2.f32 %v315_v8  ;;  %v331_v18 = vmul.f32 1.442695, %v301_v14  ;;  %v352_v41 = vmul.f32 %v803_v7, %v1126_v43 }
 0x179   :  { %816 = vpow2.f32 %v333_v10  ;;  %v364_v16 = vsel %vm45_vm0, %v344_v12, 0.0 }
 0x17a   :  { %v805_v9 = vpop.eup %804  ;;  %818 = vpow2.f32 %v331_v18  ;;  %v388_v44 = vsel %vm45_vm0, %v352_v41, 0.0 }
 0x17b   :  { %v807_v63 = vpop.eup %806  ;;  %v421_v15 = vsel %vm45_vm0, %v805_v9, 0.0  ;;  %v347_v21 = vmul.f32 %v805_v9, %v1126_v43 }
 0x17c   :  { %359 = vadd.xlane.f32.xlu1 %v358_v5  ;;  %413 = vadd.xlane.f32.xlu0 %v412_v6  ;;  %v418_v20 = vsel %vm45_vm0, %v807_v63, 0.0  ;;  %v346_v25 = vmul.f32 %v807_v63, %v1126_v43 }
 0x17d   :  { %v373_v0 = vsel %vm45_vm0, %v347_v21, 0.0 }
 0x17e   :  { %v370_v28 = vsel %vm45_vm0, %v346_v25, 0.0 }
 0x180   :  { %368 = vadd.xlane.f32.xlu1 %v367_v11  ;;  %437 = vadd.xlane.f32.xlu0 %v436_v54 }
 0x182   :  { %v809_v17 = vpop.eup %808 }
 0x183   :  { %v445_v19 = vsel %vm45_vm0, %v809_v17, 0.0  ;;  %v811_v22 = vpop.eup %810  ;;  %v355_v45 = vmul.f32 %v809_v17, %v1126_v43 }
 0x184   :  { %422 = vadd.xlane.f32.xlu1 %v421_v15  ;;  %365 = vadd.xlane.f32.xlu0 %v364_v16  ;;  %v813_v23 = vpop.eup %812  ;;  %v442_v24 = vsel %vm45_vm0, %v811_v22, 0.0  ;;  %v354_v50 = vmul.f32 %v811_v22, %v1126_v43 }
 0x185   :  { %v815_v26 = vpop.eup %814  ;;  %v427_v27 = vsel %vm45_vm0, %v813_v23, 0.0  ;;  %v349_v36 = vmul.f32 %v813_v23, %v1126_v43  ;;  %v397_v47 = vsel %vm45_vm0, %v355_v45, 0.0 }
 0x186   :  { %v817_v29 = vpop.eup %816  ;;  %v424_v31 = vsel %vm45_vm0, %v815_v26, 0.0  ;;  %v348_v46 = vmul.f32 %v815_v26, %v1126_v43  ;;  %v394_v52 = vsel %vm45_vm0, %v354_v50, 0.0 }
 0x187   :  { %v451_v30 = vsel %vm45_vm0, %v817_v29, 0.0  ;;  %v819_v38 = vpop.eup %818  ;;  %v379_v42 = vsel %vm45_vm0, %v349_v36, 0.0  ;;  %v357_v49 = vmul.f32 %v817_v29, %v1126_v43 }
 0x188   :  { %446 = vadd.xlane.f32.xlu1 %v445_v19  ;;  %419 = vadd.xlane.f32.xlu0 %v418_v20  ;;  %v448_v40 = vsel %vm45_vm0, %v819_v38, 0.0  ;;  %v376_v48 = vsel %vm45_vm0, %v348_v46, 0.0  ;;  %v356_v55 = vmul.f32 %v819_v38, %v1126_v43 }
 0x189   :  { %v403_v51 = vsel %vm45_vm0, %v357_v49, 0.0 }
 0x18a   :  { %v400_v56 = vsel %vm45_vm0, %v356_v55, 0.0 }
 0x18c   :  { %374 = vadd.xlane.f32.xlu1 %v373_v0  ;;  %443 = vadd.xlane.f32.xlu0 %v442_v24 }
 0x190   :  { %428 = vadd.xlane.f32.xlu1 %v427_v27  ;;  %371 = vadd.xlane.f32.xlu0 %v370_v28 }
 0x194   :  { %452 = vadd.xlane.f32.xlu1 %v451_v30  ;;  %425 = vadd.xlane.f32.xlu0 %v424_v31 }
 0x198   :  { %386 = vadd.xlane.f32.xlu1 %v385_v34  ;;  %383 = vadd.xlane.f32.xlu0 %v382_v35 }
 0x19c   :  { %392 = vadd.xlane.f32.xlu1 %v391_v39  ;;  %449 = vadd.xlane.f32.xlu0 %v448_v40 }
 0x1a0   :  { %380 = vadd.xlane.f32.xlu1 %v379_v42  ;;  %389 = vadd.xlane.f32.xlu0 %v388_v44 }
 0x1a4   :  { %398 = vadd.xlane.f32.xlu1 %v397_v47  ;;  %377 = vadd.xlane.f32.xlu0 %v376_v48 }
 0x1a8   :  { %404 = vadd.xlane.f32.xlu1 %v403_v51  ;;  %395 = vadd.xlane.f32.xlu0 %v394_v52 }
 0x1ac   :  { %401 = vadd.xlane.f32.xlu0 %v400_v56 }
 0x1f5   :  { %v411_v57 = vpop.xlane.xlu1 %410 }
 0x1f6   :  { %820 = vrcp.f32 %v411_v57 }
 0x1f9   :  { %v435_v58 = vpop.xlane.xlu1 %434  ;;  %v408_v60 = vpop.xlane.xlu0 %407 }
 0x1fa   :  { %822 = vrcp.f32 %v408_v60 }
 0x1fd   :  { %v417_v61 = vpop.xlane.xlu1 %416  ;;  %v432_v59 = vpop.xlane.xlu0 %431 }
 0x201   :  { %v441_v62 = vpop.xlane.xlu1 %440  ;;  %v363_v1 = vpop.xlane.xlu0 %362 }
 0x203   :  { %v821_v8 = vpop.eup %820 }
 0x204   :  { %v471_v10 = vmul.f32 %v821_v8, %v363_v1 }
 0x205   :  { %v360_v2 = vpop.xlane.xlu1 %359  ;;  %v414_v3 = vpop.xlane.xlu0 %413 }
 0x206   :  { %824 = vrcp.f32 %v414_v3  ;;  %v487_v14 = vsub.f32 0.0, %v471_v10 }
 0x207   :  { %826 = vrcp.f32 %v417_v61  ;;  %v823_v9 = vpop.eup %822 }
 0x208   :  { %v470_v13 = vmul.f32 %v823_v9, %v360_v2  ;;  %v504_v20 = vmul.f32 1.442695, %v487_v14 }
 0x209   :  { %v369_v4 = vpop.xlane.xlu1 %368  ;;  %v438_v53 = vpop.xlane.xlu0 %437 }
 0x20a   :  { %v486_v18 = vsub.f32 0.0, %v470_v13 }
 0x20c   :  { %v502_v24 = vmul.f32 1.442695, %v486_v18 }
 0x20d   :  { %v423_v43 = vpop.xlane.xlu1 %422  ;;  %v366_v5 = vpop.xlane.xlu0 %365 }
 0x20e   :  { %828 = vrcp.f32 %v423_v43 }
 0x211   :  { %v447_v6 = vpop.xlane.xlu1 %446  ;;  %v420_v7 = vpop.xlane.xlu0 %419 }
 0x212   :  { %830 = vrcp.f32 %v420_v7 }
 0x213   :  { %832 = vrcp.f32 %v432_v59  ;;  %v825_v12 = vpop.eup %824 }
 0x214   :  { %v827_v63 = vpop.eup %826  ;;  %834 = vrcp.f32 %v435_v58  ;;  %v472_v15 = vmul.f32 %v825_v12, %v366_v5 }
 0x215   :  { %v375_v11 = vpop.xlane.xlu1 %374  ;;  %v444_v54 = vpop.xlane.xlu0 %443  ;;  %836 = vrcp.f32 %v441_v62  ;;  %v473_v19 = vmul.f32 %v827_v63, %v369_v4 }
 0x216   :  { %838 = vrcp.f32 %v438_v53  ;;  %v488_v21 = vsub.f32 0.0, %v472_v15 }
 0x217   :  { %v489_v25 = vsub.f32 0.0, %v473_v19 }
 0x218   :  { %v506_v27 = vmul.f32 1.442695, %v488_v21 }
 0x219   :  { %v429_v16 = vpop.xlane.xlu1 %428  ;;  %v372_v17 = vpop.xlane.xlu0 %371  ;;  %v508_v32 = vmul.f32 1.442695, %v489_v25 }
 0x21a   :  { %840 = vrcp.f32 %v429_v16 }
 0x21b   :  { %v829_v0 = vpop.eup %828  ;;  %842 = vrcp.f32 %v447_v6 }
 0x21c   :  { %v475_v28 = vmul.f32 %v829_v0, %v375_v11 }
 0x21d   :  { %v453_v22 = vpop.xlane.xlu1 %452  ;;  %v426_v23 = vpop.xlane.xlu0 %425 }
 0x21e   :  { %844 = vrcp.f32 %v426_v23  ;;  %v491_v38 = vsub.f32 0.0, %v475_v28 }
 0x21f   :  { %v831_v26 = vpop.eup %830  ;;  %846 = vpow2.f32 %v504_v20 }
 0x220   :  { %v833_v31 = vpop.eup %832  ;;  %848 = vpow2.f32 %v502_v24  ;;  %v474_v33 = vmul.f32 %v831_v26, %v372_v17  ;;  %v512_v48 = vmul.f32 1.442695, %v491_v38 }
 0x221   :  { %v387_v29 = vpop.xlane.xlu1 %386  ;;  %v384_v30 = vpop.xlane.xlu0 %383  ;;  %850 = vrcp.f32 %v444_v54 }
 0x222   :  { %v478_v34 = vmul.f32 %v833_v31, %v384_v30  ;;  %v490_v35 = vsub.f32 0.0, %v474_v33  ;;  %852 = vrcp.f32 %v453_v22  ;;  %v835_v37 = vpop.eup %834 }
 0x223   :  { %854 = vpow2.f32 %v506_v27  ;;  %v479_v41 = vmul.f32 %v835_v37, %v387_v29  ;;  %v837_v42 = vpop.eup %836 }
 0x224   :  { %856 = vpow2.f32 %v508_v32  ;;  %v510_v36 = vmul.f32 1.442695, %v490_v35  ;;  %v494_v44 = vsub.f32 0.0, %v478_v34  ;;  %v839_v45 = vpop.eup %838  ;;  %v582_v32 = vlaneseq }
 0x225   :  { %v393_v39 = vpop.xlane.xlu1 %392  ;;  %v450_v40 = vpop.xlane.xlu0 %449  ;;  %v495_v51 = vsub.f32 0.0, %v479_v41 }
 0x226   :  { %858 = vrcp.f32 %v450_v40  ;;  %v481_v46 = vmul.f32 %v837_v42, %v393_v39  ;;  %v518_v56 = vmul.f32 1.442695, %v494_v44  ;;  %v1188_v37 = vand.u32 127, %v582_v32 }
 0x227   :  { %860 = vpow2.f32 %v510_v36  ;;  %v841_v47 = vpop.eup %840  ;;  %v520_v3 = vmul.f32 1.442695, %v495_v51 }
 0x228   :  { %v843_v57 = vpop.eup %842  ;;  %v497_v58 = vsub.f32 0.0, %v481_v46  ;;  %862 = vpow2.f32 %v512_v48  ;;  %v595_v44 = vadd.s32 4294967280, %v1188_v37  ;;  %v1191_v46 = vshrl.u32 %v582_v32, 7 }
 0x229   :  { %v381_v49 = vpop.xlane.xlu1 %380  ;;  %v390_v50 = vpop.xlane.xlu0 %389  ;;  %864 = vpow2.f32 %v518_v56  ;;  %v602_v56 = vadd.s32 4294967272, %v1188_v37 }
 0x22a   :  { %v477_v52 = vmul.f32 %v841_v47, %v381_v49  ;;  %v480_v55 = vmul.f32 %v839_v45, %v390_v50  ;;  %v524_v8 = vmul.f32 1.442695, %v497_v58  ;;  %v588_v47 = vadd.s32 4294967288, %v1188_v37 }
 0x22b   :  { %v845_v59 = vpop.eup %844 }
 0x22c   :  { %v493_v60 = vsub.f32 0.0, %v477_v52  ;;  %v496_v61 = vsub.f32 0.0, %v480_v55  ;;  %v847_v2 = vpop.eup %846  ;;  %v586_v55 = vsub.s32 %v1188_v37, %v1191_v46 }
 0x22d   :  { %v399_v62 = vpop.xlane.xlu1 %398  ;;  %v378_v1 = vpop.xlane.xlu0 %377  ;;  %v535_v54 = vadd.f32 1.0, %v847_v2 }
 0x22e   :  { %v516_v4 = vmul.f32 1.442695, %v493_v60  ;;  %v483_v53 = vmul.f32 %v843_v57, %v399_v62  ;;  %v476_v43 = vmul.f32 %v845_v59, %v378_v1  ;;  %v849_v5 = vpop.eup %848  ;;  %v522_v6 = vmul.f32 1.442695, %v496_v61 }
 0x22f   :  { %v851_v7 = vpop.eup %850  ;;  %v534_v20 = vadd.f32 1.0, %v849_v5  ;;  %v598_v60 = vsub.s32 %v595_v44, %v1191_v46  ;;  %v609_v61 = vadd.s32 4294967264, %v1188_v37  ;;  %v591_v62 = vsub.s32 %v588_v47, %v1191_v46 }
 0x230   :  { %866 = vpow2.f32 %v516_v4  ;;  %v499_v9 = vsub.f32 0.0, %v483_v53  ;;  %v492_v10 = vsub.f32 0.0, %v476_v43  ;;  %v853_v11 = vpop.eup %852  ;;  %v616_v1 = vadd.s32 4294967256, %v1188_v37 }
 0x231   :  { %v405_v12 = vpop.xlane.xlu1 %404  ;;  %v396_v13 = vpop.xlane.xlu0 %395  ;;  %868 = vpow2.f32 %v520_v3  ;;  %v605_v43 = vsub.s32 %v602_v56, %v1191_v46  ;;  %v679_v44 = vadd.s32 4294967184, %v1188_v37 }
 0x232   :  { %v855_v63 = vpop.eup %854  ;;  %v514_v14 = vmul.f32 1.442695, %v492_v10  ;;  %v485_v15 = vmul.f32 %v853_v11, %v405_v12  ;;  %v482_v16 = vmul.f32 %v851_v7, %v396_v13  ;;  %870 = vpow2.f32 %v522_v6 }
 0x233   :  { %v857_v17 = vpop.eup %856  ;;  %v528_v18 = vmul.f32 1.442695, %v499_v9  ;;  %872 = vpow2.f32 %v524_v8  ;;  %v536_v23 = vadd.f32 1.0, %v855_v63  ;;  %v612_v7 = vsub.s32 %v609_v61, %v1191_v46 }
 0x234   :  { %v859_v19 = vpop.eup %858  ;;  %v501_v21 = vsub.f32 0.0, %v485_v15  ;;  %874 = vpow2.f32 %v514_v14  ;;  %v498_v0 = vsub.f32 0.0, %v482_v16  ;;  %v537_v25 = vadd.f32 1.0, %v857_v17 }
 0x235   :  { %v861_v22 = vpop.eup %860  ;;  %v402_v24 = vpop.xlane.xlu0 %401  ;;  %876 = vrcp.f32 %v535_v54  ;;  %v619_v11 = vsub.s32 %v616_v1, %v1191_v46  ;;  %v637_v12 = vadd.s32 4294967232, %v1188_v37  ;;  %v623_v13 = vadd.s32 4294967248, %v1188_v37 }
 0x236   :  { %v484_v26 = vmul.f32 %v859_v19, %v402_v24  ;;  %878 = vpow2.f32 %v528_v18  ;;  %v532_v27 = vmul.f32 1.442695, %v501_v21  ;;  %v538_v28 = vadd.f32 1.0, %v861_v22  ;;  %v863_v31 = vpop.eup %862 }
 0x237   :  { %880 = vrcp.f32 %v534_v20  ;;  %v526_v30 = vmul.f32 1.442695, %v498_v0  ;;  %v865_v34 = vpop.eup %864  ;;  %v539_v38 = vadd.f32 1.0, %v863_v31  ;;  %v630_v15 = vadd.s32 4294967240, %v1188_v37 }
 0x238   :  { %v500_v29 = vsub.f32 0.0, %v484_v26  ;;  %882 = vrcp.f32 %v536_v23  ;;  %v542_v40 = vadd.f32 1.0, %v865_v34  ;;  %v644_v19 = vadd.s32 4294967224, %v1188_v37 }
 0x239   :  { %884 = vrcp.f32 %v537_v25  ;;  %v651_v21 = vadd.s32 4294967216, %v1188_v37  ;;  %v658_v22 = vadd.s32 4294967208, %v1188_v37  ;;  %v626_v0 = vsub.s32 %v623_v13, %v1191_v46 }
 0x23a   :  { %v530_v33 = vmul.f32 1.442695, %v500_v29  ;;  %886 = vpow2.f32 %v532_v27  ;;  %v633_v26 = vsub.s32 %v630_v15, %v1191_v46  ;;  %v640_v29 = vsub.s32 %v637_v12, %v1191_v46 }
 0x23b   :  { %888 = vrcp.f32 %v538_v28  ;;  %v661_v34 = vsub.s32 %v658_v22, %v1191_v46 }
 0x23c   :  { %890 = vpow2.f32 %v526_v30  ;;  %v647_v30 = vsub.s32 %v644_v19, %v1191_v46 }
 0x23d   :  { %v867_v35 = vpop.eup %866  ;;  %892 = vpow2.f32 %v530_v33  ;;  %v654_v33 = vsub.s32 %v651_v21, %v1191_v46 }
 0x23e   :  { %v869_v39 = vpop.eup %868  ;;  %v541_v41 = vadd.f32 1.0, %v867_v35  ;;  %894 = vrcp.f32 %v539_v38 }
 0x23f   :  { %v871_v36 = vpop.eup %870  ;;  %v543_v48 = vadd.f32 1.0, %v869_v39  ;;  %896 = vrcp.f32 %v542_v40  ;;  %v665_v39 = vadd.s32 4294967200, %v1188_v37  ;;  %v672_v40 = vadd.s32 4294967192, %v1188_v37 }
 0x240   :  { %v873_v42 = vpop.eup %872  ;;  %v544_v50 = vadd.f32 1.0, %v871_v36  ;;  %898 = vrcp.f32 %v541_v41 }
 0x241   :  { %v875_v45 = vpop.eup %874  ;;  %v545_v57 = vadd.f32 1.0, %v873_v42  ;;  %v668_v56 = vsub.s32 %v665_v39, %v1191_v46  ;;  %v675_v61 = vsub.s32 %v672_v40, %v1191_v46 }
 0x242   :  { %v877_v49 = vpop.eup %876  ;;  %v540_v51 = vadd.f32 1.0, %v875_v45 }
 0x243   :  { %v879_v52 = vpop.eup %878  ;;  %v592_v10 = vrot.slane %v877_v49, %v591_v62 }
 0x244   :  { %v881_v58 = vpop.eup %880  ;;  %900 = vrcp.f32 %v540_v51  ;;  %v547_v3 = vadd.f32 1.0, %v879_v52  ;;  %v686_v51 = vadd.s32 4294967176, %v1188_v37 }
 0x245   :  { %v883_v59 = vpop.eup %882  ;;  %902 = vrcp.f32 %v543_v48  ;;  %v587_v53 = vrot.slane %v881_v58, %v586_v55 }
 0x246   :  { %v885_v2 = vpop.eup %884  ;;  %904 = vrcp.f32 %v544_v50  ;;  %v599_v6 = vrot.slane %v883_v59, %v598_v60  ;;  %v682_v59 = vsub.s32 %v679_v44, %v1191_v46 }
 0x247   :  { %v887_v4 = vpop.eup %886  ;;  %906 = vrcp.f32 %v545_v57  ;;  %v594_v14 = vsel %vm593_vm1, %v592_v10, %v587_v53  ;;  %v606_v20 = vrot.slane %v885_v2, %v605_v43 }
 0x248   :  { %v889_v5 = vpop.eup %888  ;;  %v549_v8 = vadd.f32 1.0, %v887_v4  ;;  %908 = vrcp.f32 %v547_v3  ;;  %v601_v17 = vsel %vm600_vm2, %v599_v6, %v594_v14  ;;  %v689_v4 = vsub.s32 %v686_v51, %v1191_v46 }
 0x249   :  { %v891_v9 = vpop.eup %890  ;;  %v613_v18 = vrot.slane %v889_v5, %v612_v7  ;;  %v608_v25 = vsel %vm607_vm3, %v606_v20, %v601_v17 }
 0x24a   :  { %v893_v54 = vpop.eup %892  ;;  %v546_v63 = vadd.f32 1.0, %v891_v9  ;;  %910 = vrcp.f32 %v549_v8 }
 0x24b   :  { %v548_v16 = vadd.f32 1.0, %v893_v54  ;;  %v895_v23 = vpop.eup %894  ;;  %v615_v28 = vsel %vm614_vm4, %v613_v18, %v608_v25 }
 0x24c   :  { %912 = vrcp.f32 %v546_v63  ;;  %v897_v24 = vpop.eup %896  ;;  %v620_v32 = vrot.slane %v895_v23, %v619_v11 }
 0x24d   :  { %914 = vrcp.f32 %v548_v16  ;;  %v899_v27 = vpop.eup %898  ;;  %v641_v47 = vrot.slane %v897_v24, %v640_v29 }
 0x24e   :  { %v634_v41 = vrot.slane %v899_v27, %v633_v26  ;;  %v622_v42 = vsel %vm621_vm5, %v620_v32, %v615_v28 }
 0x251   :  { %v901_v31 = vpop.eup %900 }
 0x252   :  { %v903_v35 = vpop.eup %902  ;;  %v627_v38 = vrot.slane %v901_v31, %v626_v0 }
 0x253   :  { %v905_v36 = vpop.eup %904  ;;  %v648_v50 = vrot.slane %v903_v35, %v647_v30 }
 0x254   :  { %v907_v45 = vpop.eup %906  ;;  %v629_v48 = vsel %vm628_vm6, %v627_v38, %v622_v42  ;;  %v655_v55 = vrot.slane %v905_v36, %v654_v33 }
 0x255   :  { %v636_v49 = vsel %vm635_vm7, %v634_v41, %v629_v48  ;;  %v909_v57 = vpop.eup %908  ;;  %v662_v60 = vrot.slane %v907_v45, %v661_v34 }
 0x256   :  { %v643_v52 = vsel %vm642_vm8, %v641_v47, %v636_v49  ;;  %v676_v43 = vrot.slane %v909_v57, %v675_v61 }
 0x257   :  { %v650_v58 = vsel %vm649_vm9, %v648_v50, %v643_v52  ;;  %v911_v62 = vpop.eup %910 }
 0x258   :  { %v657_v1 = vsel %vm656_vm10, %v655_v55, %v650_v58  ;;  %v690_v8 = vrot.slane %v911_v62, %v689_v4 }
 0x259   :  { %v913_v2 = vpop.eup %912  ;;  %v664_v3 = vsel %vm663_vm11, %v662_v60, %v657_v1 }
 0x25a   :  { %v915_v37 = vpop.eup %914  ;;  %v669_v53 = vrot.slane %v913_v2, %v668_v56 }
 0x25b   :  { %v683_v5 = vrot.slane %v915_v37, %v682_v59 }
 0x25c   :  { %v671_v6 = vsel %vm670_vm12, %v669_v53, %v664_v3 }
 0x25d   :  { %v678_v7 = vsel %vm677_vm13, %v676_v43, %v671_v6 }
 0x25e   :  { %v685_v9 = vsel %vm684_vm14, %v683_v5, %v678_v7 }
 0x25f   :  { %v692_v10 = vsel %vm691_vm15, %v690_v8, %v685_v9 }
 0x260   :  { %694 = vst [vmem:[#allocation2] sm:$0x1] %v692_v10 }
 0x261   :  { %927 = shalt.err (!%p924_p4)
}
 0x262   :  { %704 = dma.vmem_to_hbm [thread:$0]  %s702_s29, 16, %s1235_s4, [#allocation3]  }
 0x263   :  { %936 = dma.done.wait [#allocation3], 16  }
 0x264   :  { %937 = vsyncadd [#allocation3], 4294967280 }
 0x265   :  { %708 = vsyncpa [#allocation3], 1 }

</bundles_post_ra>
